<compile_context>
chip_gen: v7x
topology: tpu7x:2x2x1
jax: 0.10.0
libtpu: 0.0.40
codegen_flags: <defaults>
</compile_context>

<pallas_src>
import jax
import jax.numpy as jnp
from jax import lax
from jax.experimental import pallas as pl
from jax.experimental.pallas import tpu as pltpu

# ---- hyperparameters implied by the module (opt.*) ----
GENERATOR_SIZE = 32        # opt.generator_size
NUM_GENERATOR_LAYERS = 3   # opt.num_generator_layers
LATENT_SIZE = 64           # opt.latent_size
BN_EPS = 1e-5              # PyTorch BatchNorm1d default eps
BATCH = 16                 # small batch, multiple of the bf16 (16,128) sublane tile
PAD = 128                  # every feature dim is zero-padded to this lane width


def _layer_sizes():
    sizes = []
    size = GENERATOR_SIZE
    for _ in range(NUM_GENERATOR_LAYERS - 1):
        sizes.append((size, size * 2))
        size *= 2
    sizes.append((size, LATENT_SIZE))
    return sizes


def _generator_kernel(x_ref, w_ref, gb_ref, o_ref):
    """Fused 3x (Linear(no bias) -> BatchNorm1d(train mode) -> ReLU).

    x_ref : (B, PAD)                       bf16  zero-padded latent input
    w_ref : (PAD, NUM_GENERATOR_LAYERS*PAD) bf16 per-layer weights, pre-transposed
                                            to (Cin, Cout) and zero-padded to 128x128
    gb_ref: (8, PAD)                       f32   rows 2l / 2l+1 = gamma_l / beta_l
    o_ref : (B, PAD)                       f32   padded output (wrapper slices to 64)
    """
    b = x_ref.shape[0]
    inv_b = jnp.float32(1.0 / b)

    gb = gb_ref[...]          # (8, PAD) single tiny load for all gammas/betas
    h = x_ref[...]            # (B, PAD) bf16
    y = None
    for l in range(NUM_GENERATOR_LAYERS):
        w = w_ref[:, l * PAD:(l + 1) * PAD]                       # (PAD, PAD) bf16
        # MXU matmul, bf16 inputs, f32 accumulation; Cout lands on lanes.
        hf = jnp.dot(h, w, preferred_element_type=jnp.float32)    # (B, PAD) f32

        # One-pass batch statistics (training-mode BN, biased variance), all f32.
        s1 = jnp.sum(hf, axis=0, keepdims=True)                   # (1, PAD)
        s2 = jnp.sum(hf * hf, axis=0, keepdims=True)               # (1, PAD)
        mean = s1 * inv_b
        var = jnp.maximum(s2 * inv_b - mean * mean, 0.0)           # clamp fp round-off

        gamma = gb[2 * l:2 * l + 1, :]                             # (1, PAD)
        beta = gb[2 * l + 1:2 * l + 2, :]
        # Folded affine: scale/shift are per-channel, so the (B, PAD) tile only
        # sees one mul + one add.  rsqrt goes to the EUP (free slot).
        scale = gamma * lax.rsqrt(var + BN_EPS)
        shift = beta - mean * scale

        y = jnp.maximum(hf * scale + shift, 0.0)                   # ReLU (leaky=False)
        h = y.astype(jnp.bfloat16)                                  # bf16 feed for next MXU

    o_ref[...] = y


def init_generator_params(key):
    """Logical (unpadded) parameters matching Generator.__init__ layer sizes.

    Returns a list of (w_t, gamma, beta) with w_t pre-transposed to (Cin, Cout).
    """
    params = []
    for (c_in, c_out) in _layer_sizes():
        key, wk = jax.random.split(key)
        # PyTorch Linear weight is (Cout, Cin); generate in that layout then
        # transpose once host-side so the kernel does a plain x @ w.
        w = (jax.random.normal(wk, (c_out, c_in), dtype=jnp.float32)
             * (1.0 / jnp.sqrt(jnp.float32(c_in))))
        w_t = jnp.asarray(w.T)                                   # (Cin, Cout)
        gamma = jnp.ones((c_out,), dtype=jnp.float32)            # BN weight default
        beta = jnp.zeros((c_out,), dtype=jnp.float32)            # BN bias default
        params.append((w_t, gamma, beta))
    return params


def pack_generator_params(params):
    """Pack params into the two kernel inputs.

    w_slab : (PAD, NUM_GENERATOR_LAYERS*PAD) bf16, layer l occupies lanes
             [l*PAD, (l+1)*PAD); rows/cols beyond (Cin, Cout) are zero.
    gb_slab: (8, PAD) f32, rows 2l / 2l+1 = gamma_l / beta_l; padded lanes are 0
             so padded channels stay exactly 0 through BN + ReLU.
    """
    w_slab = jnp.zeros((PAD, NUM_GENERATOR_LAYERS * PAD), dtype=jnp.bfloat16)
    gb_slab = jnp.zeros((8, PAD), dtype=jnp.float32)
    for l, (w_t, gamma, beta) in enumerate(params):
        c_in, c_out = w_t.shape
        w_slab = w_slab.at[:c_in, l * PAD:l * PAD + c_out].set(w_t.astype(jnp.bfloat16))
        gb_slab = gb_slab.at[2 * l, :c_out].set(gamma)
        gb_slab = gb_slab.at[2 * l + 1, :c_out].set(beta)
    return w_slab, gb_slab


@jax.jit
def generator_forward(x, w_slab, gb_slab):
    b, c_in = x.shape
    # Pad the input feature dim to 128 lanes and cast to bf16 once, outside the kernel.
    xp = jnp.zeros((b, PAD), dtype=jnp.bfloat16).at[:, :c_in].set(x.astype(jnp.bfloat16))

    flops = 2 * b * PAD * PAD * NUM_GENERATOR_LAYERS
    bytes_accessed = (b * PAD * 2                      # xp (bf16)
                      + w_slab.size * 2                # weights (bf16)
                      + gb_slab.size * 4               # gamma/beta (f32)
                      + b * PAD * 4)                   # output (f32)

    out_pad = pl.pallas_call(
        _generator_kernel,
        out_shape=jax.ShapeDtypeStruct((b, PAD), jnp.float32),
        in_specs=[pl.BlockSpec(memory_space=pltpu.VMEM)] * 3,
        out_specs=pl.BlockSpec(memory_space=pltpu.VMEM),
        cost_estimate=pl.CostEstimate(
            flops=flops,
            transcendentals=NUM_GENERATOR_LAYERS * PAD,
            bytes_accessed=bytes_accessed),
    )(xp, w_slab, gb_slab)
    return out_pad[:, :LATENT_SIZE]


# ---------------- pure-JAX references for correctness cross-checks ----------------

def _reference_forward_f32(x, params):
    """Full-f32 forward: exactly the PyTorch module's math (train-mode BN)."""
    h = x
    for (w_t, gamma, beta) in params:
        h = h @ w_t
        mean = jnp.mean(h, axis=0, keepdims=True)
        var = jnp.mean((h - mean) ** 2, axis=0, keepdims=True)
        h = (h - mean) * lax.rsqrt(var + BN_EPS) * gamma[None, :] + beta[None, :]
        h = jnp.maximum(h, 0.0)
    return h


def _reference_forward_bf16_matmul(x, params):
    """Mirrors the kernel math exactly (bf16 MXU operands, one-pass f32 BN stats)."""
    h = x.astype(jnp.bfloat16)
    y = None
    for (w_t, gamma, beta) in params:
        hf = jnp.dot(h, w_t.astype(jnp.bfloat16), preferred_element_type=jnp.float32)
        mean = jnp.mean(hf, axis=0, keepdims=True)
        var = jnp.maximum(jnp.mean(hf * hf, axis=0, keepdims=True) - mean * mean, 0.0)
        scale = gamma[None, :] * lax.rsqrt(var + BN_EPS)
        shift = beta[None, :] - mean * scale
        y = jnp.maximum(hf * scale + shift, 0.0)
        h = y.astype(jnp.bfloat16)
    return y


if __name__ == "__main__":
    key = jax.random.PRNGKey(0)
    key, xk = jax.random.split(key)
    x = jax.random.normal(xk, (BATCH, GENERATOR_SIZE), dtype=jnp.float32)

    params = init_generator_params(key)
    w_slab, gb_slab = pack_generator_params(params)

    out = generator_forward(x, w_slab, gb_slab)
    out = jax.block_until_ready(out)

    expected_shape = (BATCH, LATENT_SIZE)
    assert out.shape == expected_shape, (out.shape, expected_shape)
    assert bool(jnp.all(jnp.isfinite(out)))

    # Tight check against a reference that does exactly the kernel's math.
    ref_exact = _reference_forward_bf16_matmul(x, params)
    assert bool(jnp.allclose(out, ref_exact, atol=1e-3, rtol=1e-3)), \
        float(jnp.max(jnp.abs(out - ref_exact)))

    # Looser semantic check against the full-f32 PyTorch-equivalent forward
    # (difference is only the bf16 rounding of the MXU operands).
    ref_f32 = _reference_forward_f32(x, params)
    assert bool(jnp.allclose(out, ref_f32, atol=8e-2, rtol=8e-2)), \
        float(jnp.max(jnp.abs(out - ref_f32)))

    print("KERNEL_OK")
</pallas_src>

<mosaic_0001>
module attributes {stable_mosaic.version = 11 : i64} {
  func.func @_generator_kernel(%arg0: memref<16x128xbf16, #tpu.memory_space<vmem>>, %arg1: memref<128x384xbf16, #tpu.memory_space<vmem>>, %arg2: memref<8x128xf32, #tpu.memory_space<vmem>>, %arg3: memref<16x128xf32, #tpu.memory_space<vmem>>) attributes {dimension_semantics = [], scalar_prefetch = 0 : i64, scratch_operands = 0 : i64, tpu.core_type = #tpu.core_type<tc>} {
    %c0 = arith.constant 0 : index
    %c0_0 = arith.constant 0 : index
    %0 = vector.load %arg2[%c0, %c0_0] : memref<8x128xf32, #tpu.memory_space<vmem>>, vector<8x128xf32>
    %c0_1 = arith.constant 0 : index
    %c0_2 = arith.constant 0 : index
    %1 = vector.load %arg0[%c0_1, %c0_2] : memref<16x128xbf16, #tpu.memory_space<vmem>>, vector<16x128xbf16>
    %c0_3 = arith.constant 0 : index
    %c0_4 = arith.constant 0 : index
    %2 = vector.load %arg1[%c0_3, %c0_4] : memref<128x384xbf16, #tpu.memory_space<vmem>>, vector<128x128xbf16>
    %cst = arith.constant dense<0.000000e+00> : vector<16x128xf32>
    %3 = tpu.matmul %1, %2, %cst {dimension_numbers = #tpu.dot_dimension_numbers<[1], [0], [0], [1], [0, 0, 1, 1], [], []>} : vector<16x128xbf16>, vector<128x128xbf16>, vector<16x128xf32> -> vector<16x128xf32>
    %cst_5 = arith.constant dense<0.000000e+00> : vector<128xf32>
    %4 = vector.multi_reduction <add>, %3, %cst_5 [0] : vector<16x128xf32> to vector<128xf32>
    %5 = vector.shape_cast %4 : vector<128xf32> to vector<1x128xf32>
    %6 = arith.mulf %3, %3 : vector<16x128xf32>
    %cst_6 = arith.constant dense<0.000000e+00> : vector<128xf32>
    %7 = vector.multi_reduction <add>, %6, %cst_6 [0] : vector<16x128xf32> to vector<128xf32>
    %8 = vector.shape_cast %7 : vector<128xf32> to vector<1x128xf32>
    %cst_7 = arith.constant 6.250000e-02 : f32
    %9 = vector.broadcast %cst_7 : f32 to vector<1x128xf32>
    %10 = arith.mulf %5, %9 : vector<1x128xf32>
    %cst_8 = arith.constant 6.250000e-02 : f32
    %11 = vector.broadcast %cst_8 : f32 to vector<1x128xf32>
    %12 = arith.mulf %8, %11 : vector<1x128xf32>
    %13 = arith.mulf %10, %10 : vector<1x128xf32>
    %14 = arith.subf %12, %13 : vector<1x128xf32>
    %cst_9 = arith.constant 0.000000e+00 : f32
    %15 = vector.broadcast %cst_9 : f32 to vector<1x128xf32>
    %16 = arith.maximumf %14, %15 : vector<1x128xf32>
    %17 = vector.extract_strided_slice %0 {offsets = [0, 0], sizes = [1, 128], strides = [1, 1]} : vector<8x128xf32> to vector<1x128xf32>
    %18 = vector.extract_strided_slice %0 {offsets = [1, 0], sizes = [1, 128], strides = [1, 1]} : vector<8x128xf32> to vector<1x128xf32>
    %cst_10 = arith.constant 9.99999974E-6 : f32
    %19 = vector.broadcast %cst_10 : f32 to vector<1x128xf32>
    %20 = arith.addf %16, %19 : vector<1x128xf32>
    %21 = math.rsqrt %20 : vector<1x128xf32>
    %22 = arith.mulf %17, %21 : vector<1x128xf32>
    %23 = arith.mulf %10, %22 : vector<1x128xf32>
    %24 = arith.subf %18, %23 : vector<1x128xf32>
    %25 = vector.broadcast %22 : vector<1x128xf32> to vector<16x128xf32>
    %26 = arith.mulf %3, %25 : vector<16x128xf32>
    %27 = vector.broadcast %24 : vector<1x128xf32> to vector<16x128xf32>
    %28 = arith.addf %26, %27 : vector<16x128xf32>
    %cst_11 = arith.constant 0.000000e+00 : f32
    %29 = vector.broadcast %cst_11 : f32 to vector<16x128xf32>
    %30 = arith.maximumf %28, %29 : vector<16x128xf32>
    %31 = arith.truncf %30 : vector<16x128xf32> to vector<16x128xbf16>
    %c0_12 = arith.constant 0 : index
    %c128 = arith.constant 128 : index
    %32 = vector.load %arg1[%c0_12, %c128] : memref<128x384xbf16, #tpu.memory_space<vmem>>, vector<128x128xbf16>
    %cst_13 = arith.constant dense<0.000000e+00> : vector<16x128xf32>
    %33 = tpu.matmul %31, %32, %cst_13 {dimension_numbers = #tpu.dot_dimension_numbers<[1], [0], [0], [1], [0, 0, 1, 1], [], []>} : vector<16x128xbf16>, vector<128x128xbf16>, vector<16x128xf32> -> vector<16x128xf32>
    %cst_14 = arith.constant dense<0.000000e+00> : vector<128xf32>
    %34 = vector.multi_reduction <add>, %33, %cst_14 [0] : vector<16x128xf32> to vector<128xf32>
    %35 = vector.shape_cast %34 : vector<128xf32> to vector<1x128xf32>
    %36 = arith.mulf %33, %33 : vector<16x128xf32>
    %cst_15 = arith.constant dense<0.000000e+00> : vector<128xf32>
    %37 = vector.multi_reduction <add>, %36, %cst_15 [0] : vector<16x128xf32> to vector<128xf32>
    %38 = vector.shape_cast %37 : vector<128xf32> to vector<1x128xf32>
    %cst_16 = arith.constant 6.250000e-02 : f32
    %39 = vector.broadcast %cst_16 : f32 to vector<1x128xf32>
    %40 = arith.mulf %35, %39 : vector<1x128xf32>
    %cst_17 = arith.constant 6.250000e-02 : f32
    %41 = vector.broadcast %cst_17 : f32 to vector<1x128xf32>
    %42 = arith.mulf %38, %41 : vector<1x128xf32>
    %43 = arith.mulf %40, %40 : vector<1x128xf32>
    %44 = arith.subf %42, %43 : vector<1x128xf32>
    %cst_18 = arith.constant 0.000000e+00 : f32
    %45 = vector.broadcast %cst_18 : f32 to vector<1x128xf32>
    %46 = arith.maximumf %44, %45 : vector<1x128xf32>
    %47 = vector.extract_strided_slice %0 {offsets = [2, 0], sizes = [1, 128], strides = [1, 1]} : vector<8x128xf32> to vector<1x128xf32>
    %48 = vector.extract_strided_slice %0 {offsets = [3, 0], sizes = [1, 128], strides = [1, 1]} : vector<8x128xf32> to vector<1x128xf32>
    %cst_19 = arith.constant 9.99999974E-6 : f32
    %49 = vector.broadcast %cst_19 : f32 to vector<1x128xf32>
    %50 = arith.addf %46, %49 : vector<1x128xf32>
    %51 = math.rsqrt %50 : vector<1x128xf32>
    %52 = arith.mulf %47, %51 : vector<1x128xf32>
    %53 = arith.mulf %40, %52 : vector<1x128xf32>
    %54 = arith.subf %48, %53 : vector<1x128xf32>
    %55 = vector.broadcast %52 : vector<1x128xf32> to vector<16x128xf32>
    %56 = arith.mulf %33, %55 : vector<16x128xf32>
    %57 = vector.broadcast %54 : vector<1x128xf32> to vector<16x128xf32>
    %58 = arith.addf %56, %57 : vector<16x128xf32>
    %cst_20 = arith.constant 0.000000e+00 : f32
    %59 = vector.broadcast %cst_20 : f32 to vector<16x128xf32>
    %60 = arith.maximumf %58, %59 : vector<16x128xf32>
    %61 = arith.truncf %60 : vector<16x128xf32> to vector<16x128xbf16>
    %c0_21 = arith.constant 0 : index
    %c256 = arith.constant 256 : index
    %62 = vector.load %arg1[%c0_21, %c256] : memref<128x384xbf16, #tpu.memory_space<vmem>>, vector<128x128xbf16>
    %cst_22 = arith.constant dense<0.000000e+00> : vector<16x128xf32>
    %63 = tpu.matmul %61, %62, %cst_22 {dimension_numbers = #tpu.dot_dimension_numbers<[1], [0], [0], [1], [0, 0, 1, 1], [], []>} : vector<16x128xbf16>, vector<128x128xbf16>, vector<16x128xf32> -> vector<16x128xf32>
    %cst_23 = arith.constant dense<0.000000e+00> : vector<128xf32>
    %64 = vector.multi_reduction <add>, %63, %cst_23 [0] : vector<16x128xf32> to vector<128xf32>
    %65 = vector.shape_cast %64 : vector<128xf32> to vector<1x128xf32>
    %66 = arith.mulf %63, %63 : vector<16x128xf32>
    %cst_24 = arith.constant dense<0.000000e+00> : vector<128xf32>
    %67 = vector.multi_reduction <add>, %66, %cst_24 [0] : vector<16x128xf32> to vector<128xf32>
    %68 = vector.shape_cast %67 : vector<128xf32> to vector<1x128xf32>
    %cst_25 = arith.constant 6.250000e-02 : f32
    %69 = vector.broadcast %cst_25 : f32 to vector<1x128xf32>
    %70 = arith.mulf %65, %69 : vector<1x128xf32>
    %cst_26 = arith.constant 6.250000e-02 : f32
    %71 = vector.broadcast %cst_26 : f32 to vector<1x128xf32>
    %72 = arith.mulf %68, %71 : vector<1x128xf32>
    %73 = arith.mulf %70, %70 : vector<1x128xf32>
    %74 = arith.subf %72, %73 : vector<1x128xf32>
    %cst_27 = arith.constant 0.000000e+00 : f32
    %75 = vector.broadcast %cst_27 : f32 to vector<1x128xf32>
    %76 = arith.maximumf %74, %75 : vector<1x128xf32>
    %77 = vector.extract_strided_slice %0 {offsets = [4, 0], sizes = [1, 128], strides = [1, 1]} : vector<8x128xf32> to vector<1x128xf32>
    %78 = vector.extract_strided_slice %0 {offsets = [5, 0], sizes = [1, 128], strides = [1, 1]} : vector<8x128xf32> to vector<1x128xf32>
    %cst_28 = arith.constant 9.99999974E-6 : f32
    %79 = vector.broadcast %cst_28 : f32 to vector<1x128xf32>
    %80 = arith.addf %76, %79 : vector<1x128xf32>
    %81 = math.rsqrt %80 : vector<1x128xf32>
    %82 = arith.mulf %77, %81 : vector<1x128xf32>
    %83 = arith.mulf %70, %82 : vector<1x128xf32>
    %84 = arith.subf %78, %83 : vector<1x128xf32>
    %85 = vector.broadcast %82 : vector<1x128xf32> to vector<16x128xf32>
    %86 = arith.mulf %63, %85 : vector<16x128xf32>
    %87 = vector.broadcast %84 : vector<1x128xf32> to vector<16x128xf32>
    %88 = arith.addf %86, %87 : vector<16x128xf32>
    %cst_29 = arith.constant 0.000000e+00 : f32
    %89 = vector.broadcast %cst_29 : f32 to vector<16x128xf32>
    %90 = arith.maximumf %88, %89 : vector<16x128xf32>
    %c0_30 = arith.constant 0 : index
    %c0_31 = arith.constant 0 : index
    %91 = vector.load %arg3[%c0_30, %c0_31] : memref<16x128xf32, #tpu.memory_space<vmem>>, vector<16x128xf32>
    tpu.vector_store %arg3[%c0_30, %c0_31], %90 {strides = array<i32>} : memref<16x128xf32, #tpu.memory_space<vmem>>, vector<16x128xf32>,
    return
  }
}

</mosaic_0001>

<bundles_post_ra>
// kernel: generator_forward.1
= control target key start
LH: loop header
LB: loop body
LE: loop exit
PB: predicated region body
PF: predicated region fallthrough
CT: control target
= control target key end

     0   :  { %8 = vsyncpa [#allocation3], 0  ;;  %s807_s0 = inlined_call_operand.vmem [shape: bf16[16,128], index: 0, kind: input, shape index: {}]   ;;  %s808_s1 = inlined_call_operand.hbm [shape: bf16[128,384], index: 1, kind: input, shape index: {}]   ;;  %s809_s2 = inlined_call_operand.vmem [shape: f32[8,128], index: 2, kind: input, shape index: {}]   ;;  %s810_s3 = inlined_call_operand.hbm [shape: f32[16,128], index: 3, kind: output, shape index: {}]  }
   0x1   :  { %9 = vsyncpa [#allocation4], 0  ;;  %s703_s12 = smov [#allocation2]   ;;  %s655_s16 = scalar_lea.hbm %s808_s1, 3072 }
   0x2   :  { %s17_s13 = sshll.u32 %s703_s12, 4  ;;  %p656_p0 = scmp.ne.s32.totalorder %s808_s1, %s655_s16  ;;  %s18_s13 = int_to_ptr.vmem [resolvable:$true] %s17_s13 }
   0x3   :  { %p659_p1 = scmp.lt.u32.totalorder %s655_s16, %s808_s1 }
   0x5   :  { %p661_p2 = pnand %p659_p1, %p656_p0 }
   0x7   :  { %664 = shalt.err (!%p661_p2)
}
   0x8   :  { %s665_s21 = scalar_lea.vmem %s18_s13, 3072  ;;  %p670_p4 = scmp.lt.s32.totalorder %s18_s13, %s18_s13 }
   0x9   :  { %p666_p3 = scmp.ne.s32.totalorder %s18_s13, %s665_s21  ;;  %p671_p5 = scmp.lt.s32.totalorder %s665_s21, %s665_s21 }
   0xb   :  { %p672_p6 = por %p671_p5, %p670_p4 }
   0xd   :  { %p673_p7 = pnand %p672_p6, %p666_p3 }
   0xf   :  { %676 = shalt.err (!%p673_p7)
}
  0x10   :  { %s704_s22 = smov 192   ;;  %s705_s23 = smov 12  }
  0x11   :  { %23 = dma.hbm_to_vmem [thread:$0]  %s808_s1, 3072, %s18_s13, [#allocation3], %s704_s22, %s704_s22, %s705_s23  }
  0x12   :  { %699 = dma.done.wait [#allocation3], 3072  }
  0x13   :  { %700 = vsyncadd [#allocation3], 4294964224  ;;  %v706_v0 = vmov 0.0   ;;  %vm707_vm0 = vmmov 0   ;;  %v624_v1 = vld [vmem:[#allocation2] ss:$12 sps:$4 sm:$0xff]   ;;  %v173_v44 = vlaneseq }
  0x14   :  { %556 = vmatprep.subr.bf16.mxu0 %v706_v0  ;;  %572 = vmatprep.mubr.msk.bf16.mxu0 %vm707_vm0, %v706_v0  ;;  %v625_v2 = vld [vmem:[#allocation2 + $0x18] ss:$12 sps:$4 sm:$0xff]   ;;  %v626_v3 = vld [vmem:[#allocation2 + $0x30] ss:$12 sps:$4 sm:$0xff]   ;;  %v627_v4 = vld [vmem:[#allocation2 + $0x48] ss:$12 sps:$4 sm:$0xff]  }
  0x15   :  { %576 = vmatprep.subr.bf16.mxu1 %v706_v0  ;;  %592 = vmatprep.mubr.msk.bf16.mxu1 %vm707_vm0, %v706_v0  ;;  %v628_v5 = vld [vmem:[#allocation2 + $0x60] ss:$12 sps:$4 sm:$0xff]   ;;  %v629_v6 = vld [vmem:[#allocation2 + $0x78] ss:$12 sps:$4 sm:$0xff]   ;;  %v630_v7 = vld [vmem:[#allocation2 + $0x90] ss:$12 sps:$4 sm:$0xff]  }
  0x16   :  { %557 = vmatpush3.bf16.msra.mxu0 %v624_v1  ;;  %v631_v8 = vld [vmem:[#allocation2 + $0xa8] ss:$12 sps:$4 sm:$0xff]   ;;  %v632_v9 = vld [vmem:[%s807_s0] sm:$0xff]   ;;  %v636_v13 = vld [vmem:[#allocation2 + $0x4c] ss:$12 sps:$4 sm:$0xff]   ;;  %v769_v45 = vshrl.u32 %v173_v44, 7 }
  0x17   :  { %558 = vmatprep.subr.bf16.mxu0 %v706_v0  ;;  %v633_v10 = vld [vmem:[#allocation2 + $0x4] ss:$12 sps:$4 sm:$0xff]   ;;  %v634_v11 = vld [vmem:[#allocation2 + $0x1c] ss:$12 sps:$4 sm:$0xff]   ;;  %v635_v12 = vld [vmem:[#allocation2 + $0x34] ss:$12 sps:$4 sm:$0xff]  }
  0x18   :  { %577 = vmatpush3.bf16.msra.mxu1 %v633_v10  ;;  %v637_v14 = vld [vmem:[#allocation2 + $0x64] ss:$12 sps:$4 sm:$0xff]   ;;  %v638_v15 = vld [vmem:[#allocation2 + $0x7c] ss:$12 sps:$4 sm:$0xff]   ;;  %v639_v16 = vld [vmem:[#allocation2 + $0x94] ss:$12 sps:$4 sm:$0xff]  }
  0x19   :  { %578 = vmatprep.subr.bf16.mxu1 %v706_v0  ;;  %v640_v17 = vld [vmem:[#allocation2 + $0xac] ss:$12 sps:$4 sm:$0xff]   ;;  %v774_v46 = vld [vmem:[%s809_s2] sm:$0xff]  ;;  %v175_v47 = vsub.s32 0, %v769_v45  ;;  %v181_v55 = vsub.s32 1, %v769_v45  ;;  %s708_s2 = smov [#allocation5]  }
  0x1a   :  { %559 = vmatpush3.bf16.msra.mxu0 %v625_v2  ;;  %v641_v63 = vld [vmem:[#allocation2 + $0x8] ss:$12 sps:$4 sm:$0xff]   ;;  %v642_v1 = vld [vmem:[#allocation2 + $0x20] ss:$12 sps:$4 sm:$0xff]   ;;  %v643_v2 = vld [vmem:[#allocation2 + $0x38] ss:$12 sps:$4 sm:$0xff]  }
  0x1b   :  { %560 = vmatprep.subr.bf16.mxu0 %v706_v0  ;;  %s492_s28 = sshll.u32 %s708_s2, 4  ;;  %s493_s28 = int_to_ptr.vmem [resolvable:$true] %s492_s28 }
  0x1c   :  { %579 = vmatpush3.bf16.msra.mxu1 %v634_v11  ;;  %s677_s29 = scalar_lea.vmem %s493_s28, 256  ;;  %p682_p9 = scmp.lt.s32.totalorder %s493_s28, %s493_s28 }
  0x1d   :  { %580 = vmatprep.subr.bf16.mxu1 %v706_v0  ;;  %p678_p8 = scmp.ne.s32.totalorder %s493_s28, %s677_s29  ;;  %p683_p10 = scmp.lt.s32.totalorder %s677_s29, %s677_s29 }
  0x1e   :  { %561 = vmatpush3.bf16.msra.mxu0 %v626_v3  ;;  %v644_v3 = vld [vmem:[#allocation2 + $0x50] ss:$12 sps:$4 sm:$0xff]  }
  0x1f   :  { %562 = vmatprep.subr.bf16.mxu0 %v706_v0  ;;  %p684_p11 = por %p683_p10, %p682_p9 }
  0x20   :  { %581 = vmatpush3.bf16.msra.mxu1 %v635_v12 }
  0x21   :  { %582 = vmatprep.subr.bf16.mxu1 %v706_v0  ;;  %p685_p12 = pnand %p684_p11, %p678_p8 }
  0x22   :  { %563 = vmatpush3.bf16.msra.mxu0 %v627_v4  ;;  %v645_v4 = vld [vmem:[#allocation2 + $0x68] ss:$12 sps:$4 sm:$0xff]  }
  0x23   :  { %564 = vmatprep.subr.bf16.mxu0 %v706_v0 }
  0x24   :  { %583 = vmatpush3.bf16.msra.mxu1 %v636_v13 }
  0x25   :  { %584 = vmatprep.subr.bf16.mxu1 %v706_v0 }
  0x26   :  { %565 = vmatpush3.bf16.msra.mxu0 %v628_v5  ;;  %v646_v5 = vld [vmem:[#allocation2 + $0x80] ss:$12 sps:$4 sm:$0xff]  }
  0x27   :  { %566 = vmatprep.subr.bf16.mxu0 %v706_v0 }
  0x28   :  { %585 = vmatpush3.bf16.msra.mxu1 %v637_v14 }
  0x29   :  { %586 = vmatprep.subr.bf16.mxu1 %v706_v0 }
  0x2a   :  { %567 = vmatpush3.bf16.msra.mxu0 %v629_v6  ;;  %v647_v6 = vld [vmem:[#allocation2 + $0x98] ss:$12 sps:$4 sm:$0xff]  }
  0x2b   :  { %568 = vmatprep.subr.bf16.mxu0 %v706_v0 }
  0x2c   :  { %587 = vmatpush3.bf16.msra.mxu1 %v638_v15 }
  0x2d   :  { %588 = vmatprep.subr.bf16.mxu1 %v706_v0 }
  0x2e   :  { %569 = vmatpush3.bf16.msra.mxu0 %v630_v7  ;;  %v648_v7 = vld [vmem:[#allocation2 + $0xb0] ss:$12 sps:$4 sm:$0xff]  }
  0x2f   :  { %570 = vmatprep.subr.bf16.mxu0 %v706_v0 }
  0x30   :  { %589 = vmatpush3.bf16.msra.mxu1 %v639_v16 }
  0x31   :  { %590 = vmatprep.subr.bf16.mxu1 %v706_v0 }
  0x32   :  { %571 = vmatpush3.bf16.msra.mxu0 %v631_v8 }
  0x33   :  { %596 = vmatprep.subr.bf16.mxu0 %v706_v0 }
  0x34   :  { %591 = vmatpush3.bf16.msra.mxu1 %v640_v17 }
  0x35   :  { %573 = vmatmul.mubr.bf16.vlgmr.msra.gmra.mrb[0].mxu0 %v632_v9 }
  0x36   :  { %612 = vmatprep.mubr.msk.bf16.mxu0 %vm707_vm0, %v706_v0  ;;  %597 = vmatpush3.bf16.msra.mxu0 %v641_v63 }
  0x37   :  { %598 = vmatprep.subr.bf16.mxu0 %v706_v0 }
  0x3a   :  { %599 = vmatpush3.bf16.msra.mxu0 %v642_v1 }
  0x3b   :  { %600 = vmatprep.subr.bf16.mxu0 %v706_v0 }
  0x3e   :  { %601 = vmatpush3.bf16.msra.mxu0 %v643_v2 }
  0x3f   :  { %602 = vmatprep.subr.bf16.mxu0 %v706_v0 }
  0x42   :  { %603 = vmatpush3.bf16.msra.mxu0 %v644_v3 }
  0x43   :  { %604 = vmatprep.subr.bf16.mxu0 %v706_v0 }
  0x46   :  { %605 = vmatpush3.bf16.msra.mxu0 %v645_v4 }
  0x47   :  { %606 = vmatprep.subr.bf16.mxu0 %v706_v0 }
  0x4a   :  { %607 = vmatpush3.bf16.msra.mxu0 %v646_v5 }
  0x4b   :  { %608 = vmatprep.subr.bf16.mxu0 %v706_v0 }
  0x4e   :  { %609 = vmatpush3.bf16.msra.mxu0 %v647_v6 }
  0x4f   :  { %610 = vmatprep.subr.bf16.mxu0 %v706_v0 }
  0x52   :  { %611 = vmatpush3.bf16.msra.mxu0 %v648_v7 }
 0x108   :  { %v137_v18 = vpop.f32.mrb[0].mxu0 }
 0x109   :  { %v574_v19 = vpop.f32.mrb[1].mxu0  ;;  %v151_v21 = vmul.f32 %v137_v18, %v137_v18 }
 0x10a   :  { %v140_v20 = vpop.f32.mrb[2].mxu0 }
 0x10b   :  { %v144_v22 = vadd.f32 %v140_v20, %v137_v18  ;;  %v152_v23 = vmul.f32 %v140_v20, %v140_v20  ;;  %v575_v24 = vpop.f32.mrb[3].mxu0 }
 0x10d   :  { %v145_v25 = vrot.slane %v144_v22, 4  ;;  %v153_v26 = vadd.f32 %v152_v23, %v151_v21 }
 0x10f   :  { %v146_v27 = vadd.f32 %v145_v25, %v144_v22  ;;  %v154_v28 = vrot.slane %v153_v26, 4 }
 0x111   :  { %v147_v29 = vrot.slane %v146_v27, 2  ;;  %v155_v30 = vadd.f32 %v154_v28, %v153_v26 }
 0x113   :  { %v148_v31 = vadd.f32 %v147_v29, %v146_v27  ;;  %v156_v32 = vrot.slane %v155_v30, 2 }
 0x115   :  { %v149_v33 = vrot.slane %v148_v31, 1  ;;  %v157_v34 = vadd.f32 %v156_v32, %v155_v30 }
 0x117   :  { %v150_v35 = vadd.f32 %v149_v33, %v148_v31  ;;  %v158_v36 = vrot.slane %v157_v34, 1  ;;  %v324_v33 = vsub.s32 2, %v769_v45 }
 0x119   :  { %v159_v37 = vadd.f32 %v158_v36, %v157_v34  ;;  %v160_v38 = vmul.f32 0.0625, %v150_v35 }
 0x11b   :  { %v161_v39 = vmul.f32 0.0625, %v159_v37  ;;  %v162_v40 = vmul.f32 %v160_v38, %v160_v38 }
 0x11d   :  { %v163_v41 = vsub.f32 %v161_v39, %v162_v40 }
 0x11f   :  { %v164_v42 = vmax.f32 %v163_v41, 0.0  ;;  %v330_v41 = vsub.s32 3, %v769_v45 }
 0x121   :  { %v165_v43 = vadd.f32 1e-05, %v164_v42 }
 0x123   :  { %649 = vrsqrt.f32 %v165_v43 }
 0x12d   :  { %v650_v48 = vpop.eup %649 }
 0x12e   :  { %v167_v49 = vmul.f32 %v650_v48, %v774_v46 }
 0x130   :  { %v168_v50 = vmul.f32 %v167_v49, %v160_v38  ;;  %v176_v51 = vrot.slane %v167_v49, %v175_v47 }
 0x132   :  { %v170_v52 = vrot.slane %v168_v50, 7  ;;  %v177_v53 = vmul.f32 %v176_v51, %v137_v18  ;;  %v178_v54 = vmul.f32 %v176_v51, %v140_v20 }
 0x134   :  { %v172_v56 = vsub.f32 %v774_v46, %v170_v52 }
 0x136   :  { %v182_v57 = vrot.slane %v172_v56, %v181_v55 }
 0x138   :  { %v184_v58 = vadd.f32 %v182_v57, %v178_v54  ;;  %v183_v59 = vadd.f32 %v182_v57, %v177_v53 }
 0x13a   :  { %v185_v60 = vmax.f32 %v183_v59, 0.0  ;;  %v186_v61 = vmax.f32 %v184_v58, 0.0 }
 0x13c   :  { %v187_v62 = vpack.c.bf16 %v186_v61, %v185_v60 }
 0x13e   :  { %593 = vmatmul.mubr.bf16.vlgmr.msra.gmra.mrb[0].mxu1 %v187_v62 }
 0x211   :  { %v286_v8 = vpop.f32.mrb[0].mxu1 }
 0x212   :  { %v594_v9 = vpop.f32.mrb[1].mxu1  ;;  %v300_v11 = vmul.f32 %v286_v8, %v286_v8 }
 0x213   :  { %v289_v10 = vpop.f32.mrb[2].mxu1 }
 0x214   :  { %v293_v12 = vadd.f32 %v289_v10, %v286_v8  ;;  %v301_v13 = vmul.f32 %v289_v10, %v289_v10  ;;  %v595_v14 = vpop.f32.mrb[3].mxu1 }
 0x215   :  { %v473_v14 = vsub.s32 4, %v769_v45 }
 0x216   :  { %v294_v15 = vrot.slane %v293_v12, 4  ;;  %v302_v16 = vadd.f32 %v301_v13, %v300_v11 }
 0x218   :  { %v295_v17 = vadd.f32 %v294_v15, %v293_v12  ;;  %v303_v18 = vrot.slane %v302_v16, 4 }
 0x21a   :  { %v296_v19 = vrot.slane %v295_v17, 2  ;;  %v304_v20 = vadd.f32 %v303_v18, %v302_v16 }
 0x21c   :  { %v297_v21 = vadd.f32 %v296_v19, %v295_v17  ;;  %v305_v22 = vrot.slane %v304_v20, 2 }
 0x21e   :  { %v298_v23 = vrot.slane %v297_v21, 1  ;;  %v306_v24 = vadd.f32 %v305_v22, %v304_v20  ;;  %v479_v22 = vsub.s32 5, %v769_v45 }
 0x220   :  { %v299_v0 = vadd.f32 %v298_v23, %v297_v21  ;;  %v307_v25 = vrot.slane %v306_v24, 1 }
 0x222   :  { %v308_v26 = vadd.f32 %v307_v25, %v306_v24  ;;  %v309_v27 = vmul.f32 0.0625, %v299_v0 }
 0x224   :  { %v310_v28 = vmul.f32 0.0625, %v308_v26  ;;  %v311_v29 = vmul.f32 %v309_v27, %v309_v27 }
 0x226   :  { %v312_v30 = vsub.f32 %v310_v28, %v311_v29 }
 0x228   :  { %v313_v31 = vmax.f32 %v312_v30, 0.0 }
 0x22a   :  { %v314_v32 = vadd.f32 1e-05, %v313_v31 }
 0x22c   :  { %651 = vrsqrt.f32 %v314_v32 }
 0x236   :  { %v652_v34 = vpop.eup %651 }
 0x237   :  { %v316_v35 = vmul.f32 %v652_v34, %v774_v46 }
 0x239   :  { %v317_v36 = vmul.f32 %v316_v35, %v309_v27  ;;  %v325_v37 = vrot.slane %v316_v35, %v324_v33 }
 0x23b   :  { %v319_v38 = vrot.slane %v317_v36, 7  ;;  %v326_v39 = vmul.f32 %v325_v37, %v286_v8  ;;  %v327_v40 = vmul.f32 %v325_v37, %v289_v10 }
 0x23d   :  { %v321_v42 = vsub.f32 %v774_v46, %v319_v38 }
 0x23f   :  { %v331_v43 = vrot.slane %v321_v42, %v330_v41 }
 0x241   :  { %v332_v44 = vadd.f32 %v331_v43, %v326_v39  ;;  %v333_v47 = vadd.f32 %v331_v43, %v327_v40 }
 0x243   :  { %v335_v48 = vmax.f32 %v333_v47, 0.0  ;;  %v334_v49 = vmax.f32 %v332_v44, 0.0 }
 0x245   :  { %v336_v50 = vpack.c.bf16 %v335_v48, %v334_v49 }
 0x247   :  { %613 = vmatmul.mubr.bf16.vlgmr.msra.gmra.mrb[4].mxu0 %v336_v50 }
 0x31a   :  { %v435_v51 = vpop.f32.mrb[4].mxu0 }
 0x31b   :  { %v614_v52 = vpop.f32.mrb[5].mxu0  ;;  %v449_v54 = vmul.f32 %v435_v51, %v435_v51 }
 0x31c   :  { %v438_v53 = vpop.f32.mrb[6].mxu0 }
 0x31d   :  { %v442_v55 = vadd.f32 %v438_v53, %v435_v51  ;;  %v450_v56 = vmul.f32 %v438_v53, %v438_v53  ;;  %v615_v57 = vpop.f32.mrb[7].mxu0 }
 0x31f   :  { %v443_v58 = vrot.slane %v442_v55, 4  ;;  %v451_v59 = vadd.f32 %v450_v56, %v449_v54 }
 0x321   :  { %v444_v60 = vadd.f32 %v443_v58, %v442_v55  ;;  %v452_v61 = vrot.slane %v451_v59, 4 }
 0x323   :  { %v445_v62 = vrot.slane %v444_v60, 2  ;;  %v453_v63 = vadd.f32 %v452_v61, %v451_v59 }
 0x325   :  { %v446_v1 = vadd.f32 %v445_v62, %v444_v60  ;;  %v454_v2 = vrot.slane %v453_v63, 2 }
 0x327   :  { %v447_v3 = vrot.slane %v446_v1, 1  ;;  %v455_v4 = vadd.f32 %v454_v2, %v453_v63 }
 0x329   :  { %v448_v5 = vadd.f32 %v447_v3, %v446_v1  ;;  %v456_v6 = vrot.slane %v455_v4, 1 }
 0x32b   :  { %v457_v7 = vadd.f32 %v456_v6, %v455_v4  ;;  %v458_v8 = vmul.f32 0.0625, %v448_v5 }
 0x32d   :  { %v459_v9 = vmul.f32 0.0625, %v457_v7  ;;  %v460_v10 = vmul.f32 %v458_v8, %v458_v8 }
 0x32f   :  { %v461_v11 = vsub.f32 %v459_v9, %v460_v10 }
 0x331   :  { %v462_v12 = vmax.f32 %v461_v11, 0.0 }
 0x333   :  { %v463_v13 = vadd.f32 1e-05, %v462_v12 }
 0x335   :  { %653 = vrsqrt.f32 %v463_v13 }
 0x33f   :  { %v654_v15 = vpop.eup %653 }
 0x340   :  { %v465_v16 = vmul.f32 %v654_v15, %v774_v46 }
 0x342   :  { %v466_v17 = vmul.f32 %v465_v16, %v458_v8  ;;  %v474_v18 = vrot.slane %v465_v16, %v473_v14 }
 0x344   :  { %v468_v19 = vrot.slane %v466_v17, 7  ;;  %v475_v20 = vmul.f32 %v474_v18, %v435_v51  ;;  %v476_v21 = vmul.f32 %v474_v18, %v438_v53 }
 0x346   :  { %v470_v23 = vsub.f32 %v774_v46, %v468_v19 }
 0x348   :  { %v480_v24 = vrot.slane %v470_v23, %v479_v22 }
 0x34a   :  { %v481_v0 = vadd.f32 %v480_v24, %v475_v20  ;;  %v482_v25 = vadd.f32 %v480_v24, %v476_v21 }
 0x34c   :  { %v483_v26 = vmax.f32 %v481_v0, 0.0  ;;  %v484_v27 = vmax.f32 %v482_v25, 0.0 }
 0x34e   :  { %486 = vst [vmem:[#allocation5 + $0x8] sm:$0xff] %v484_v27  ;;  %485 = vst [vmem:[#allocation5] sm:$0xff] %v483_v26 }
 0x34f   :  { %688 = shalt.err (!%p685_p12)
}
 0x350   :  { %s689_s5 = scalar_lea.hbm %s810_s3, 256 }
 0x351   :  { %p690_p13 = scmp.ne.s32.totalorder %s810_s3, %s689_s5  ;;  %p693_p0 = scmp.lt.u32.totalorder %s689_s5, %s810_s3 }
 0x353   :  { %p695_p1 = pnand %p693_p0, %p690_p13 }
 0x355   :  { %698 = shalt.err (!%p695_p1)
}
 0x356   :  { %s709_s10 = smov 128   ;;  %s710_s11 = smov 8  }
 0x357   :  { %498 = dma.vmem_to_hbm [thread:$0]  %s493_s28, 256, %s810_s3, [#allocation4], %s709_s10, %s709_s10, %s710_s11  }
 0x358   :  { %701 = dma.done.wait [#allocation4], 256  }
 0x359   :  { %702 = vsyncadd [#allocation4], 4294967040 }
 0x35a   :  { %502 = vsyncpa [#allocation3], 1 }
 0x35b   :  { %503 = vsyncpa [#allocation4], 1 }

</bundles_post_ra>
